<compile_context>
chip_gen: v7x
topology: tpu7x:2x2x1
jax: 0.10.0
libtpu: 0.0.40
codegen_flags: <defaults>
</compile_context>

<pallas_src>
import functools
import math

import jax
import jax.numpy as jnp
import numpy as np
from jax import lax
from jax.experimental import pallas as pl
from jax.experimental.pallas import tpu as pltpu

SUBLANE = 8     # f32 sublane tile
LANE = 128      # lane tile


def _round_up(x, m):
    return (x + m - 1) // m * m


def _pick_time_chunk(T, cap=128):
    """Fewest chunks of size <= cap; T is then padded up to a multiple of the
    chunk (padded steps are masked in-kernel), so awkward T stays efficient."""
    n_chunks = -(-T // cap)
    return -(-T // n_chunks)


# ----------------------------------------------------------------------------
# Pallas kernels
# ----------------------------------------------------------------------------
def embed_kernel(ids_ref, table_ref, out_ref):
    """Embedding row gather, one time step per grid step.

    ids_ref:   [Tp * Bp]    int32, SMEM (time-major flattened, padded slots = 0)
    table_ref: [V, Dp]      float32, VMEM (row 0 all-zero -> padding_idx=0)
    out_ref:   [1, Bp, Dp]  float32, VMEM (this time step's block)
    """
    t = pl.program_id(0)
    _, Bp, _ = out_ref.shape
    # Static per-row stores (no concatenate / XLU shuffling); the table row
    # read is a dynamic-sublane slice of the compact [V, Dp] table.
    for b in range(Bp):
        idx = ids_ref[t * Bp + b]
        out_ref[0, pl.ds(b, 1), :] = table_ref[pl.ds(idx, 1), :]
    # TODO(synk): large-vocab variant -- keep the table in HBM and DMA rows.


def lstm_bidir_kernel(x_ref, wih_ref, whh_ref, b_ref, out_ref,
                      gin_ref, h_ref, c_ref, *, t_real, t_total, unroll):
    """Bidirectional LSTM layer.  grid = (direction, time-chunk).

    x_ref:   [Tt, Bp, Dp]   current time chunk (chunks visited in reverse for bwd)
    wih_ref: [1, Dp, 4Hp]   input->gate weights of this direction
    whh_ref: [1, Hp, 4Hp]   hidden->gate weights of this direction
    b_ref:   [1, 1, 4Hp]    bias (b_ih + b_hh) of this direction
    out_ref: [Tt, Bp, Hp]   this direction's column half of the [Tp, Bp, 2Hp] output
    gin_ref: [Tt, Bp, 4Hp]  scratch: hoisted input projection for the chunk
    h_ref, c_ref: [Bp, Hp]  scratch: recurrent state, persists across chunks
    """
    d = pl.program_id(0)          # 0 = forward, 1 = backward
    tc = pl.program_id(1)         # time-chunk counter (chunk order reversed for bwd)
    n_tc = pl.num_programs(1)
    Tt, Bp, Dp = x_ref.shape
    Hp = h_ref.shape[1]

    @pl.when(tc == 0)
    def _init():
        h_ref[...] = jnp.zeros_like(h_ref)
        c_ref[...] = jnp.zeros_like(c_ref)

    # Hoisted input projection: one big [Tt*Bp, Dp] x [Dp, 4Hp] matmul per chunk,
    # off the recurrent critical path.
    x_flat = x_ref[...].reshape(Tt * Bp, Dp)
    gin = jnp.dot(x_flat, wih_ref[0], preferred_element_type=jnp.float32) + b_ref[0]
    gin_ref[...] = gin.reshape(Tt, Bp, 4 * Hp)

    w_hh = whh_ref[0]                             # hoisted out of the step body
    blk = tc + d * (n_tc - 1 - 2 * tc)            # this direction's chunk block
    t0 = blk * Tt                                 # global time of local index 0

    def step(k, carry):
        h, c = carry
        # local time index inside the chunk: forward -> k, backward -> Tt-1-k
        t = k + d * (Tt - 1 - 2 * k)
        gates = gin_ref[t] + jnp.dot(h, w_hh, preferred_element_type=jnp.float32)
        i = jax.nn.sigmoid(gates[:, 0 * Hp:1 * Hp])
        f = jax.nn.sigmoid(gates[:, 1 * Hp:2 * Hp])
        g = jnp.tanh(gates[:, 2 * Hp:3 * Hp])
        o = jax.nn.sigmoid(gates[:, 3 * Hp:4 * Hp])
        c = f * c + i * g
        h = o * jnp.tanh(c)
        if t_total > t_real:
            # Padded time steps: force state (and stored output) to zero so the
            # backward direction enters the real region with zero state.
            valid = ((t0 + t) < t_real).astype(jnp.float32)
            h = h * valid
            c = c * valid
        out_ref[t] = h
        return (h, c)

    # h/c carried as vreg loop carries; scratch touched once per chunk.
    h_fin, c_fin = lax.fori_loop(0, Tt, step, (h_ref[...], c_ref[...]),
                                 unroll=unroll)
    h_ref[...] = h_fin
    c_ref[...] = c_fin


# ----------------------------------------------------------------------------
# Wrappers (glue)
# ----------------------------------------------------------------------------
def embed_lookup(ids_tm_flat, table_p, Tp, Bp, Dp):
    return pl.pallas_call(
        embed_kernel,
        out_shape=jax.ShapeDtypeStruct((Tp, Bp, Dp), jnp.float32),
        grid=(Tp,),
        in_specs=[pl.BlockSpec(memory_space=pltpu.MemorySpace.SMEM),
                  pl.BlockSpec(memory_space=pltpu.MemorySpace.VMEM)],
        out_specs=pl.BlockSpec((1, Bp, Dp), lambda t: (t, 0, 0)),
        compiler_params=pltpu.CompilerParams(
            dimension_semantics=("arbitrary",)),
    )(ids_tm_flat, table_p)


def lstm_bidir_layer(x, wih, whh, b, *, t_chunk, t_real, unroll=8):
    """x: [Tp, Bp, Dp]; wih: [2, Dp, 4Hp]; whh: [2, Hp, 4Hp]; b: [2, 1, 4Hp]."""
    Tp, Bp, Dp = x.shape
    Hp4 = wih.shape[2]
    Hp = Hp4 // 4
    n_tc = Tp // t_chunk

    def time_blk(d, tc):
        # forward walks chunks 0..n_tc-1, backward walks them in reverse
        return tc + d * (n_tc - 1 - 2 * tc)

    kernel = functools.partial(lstm_bidir_kernel, t_real=t_real, t_total=Tp,
                               unroll=min(unroll, t_chunk))

    return pl.pallas_call(
        kernel,
        out_shape=jax.ShapeDtypeStruct((Tp, Bp, 2 * Hp), jnp.float32),
        grid_spec=pltpu.PrefetchScalarGridSpec(
            num_scalar_prefetch=0,
            grid=(2, n_tc),
            in_specs=[
                pl.BlockSpec((t_chunk, Bp, Dp),
                             lambda d, tc: (time_blk(d, tc), 0, 0)),
                pl.BlockSpec((1, Dp, Hp4), lambda d, tc: (d, 0, 0)),
                pl.BlockSpec((1, Hp, Hp4), lambda d, tc: (d, 0, 0)),
                pl.BlockSpec((1, 1, Hp4), lambda d, tc: (d, 0, 0)),
            ],
            out_specs=pl.BlockSpec((t_chunk, Bp, Hp),
                                   lambda d, tc: (time_blk(d, tc), 0, d)),
            scratch_shapes=[
                pltpu.VMEM((t_chunk, Bp, Hp4), jnp.float32),   # gin (input proj)
                pltpu.VMEM((Bp, Hp), jnp.float32),             # h
                pltpu.VMEM((Bp, Hp), jnp.float32),             # c
            ],
        ),
        compiler_params=pltpu.CompilerParams(
            dimension_semantics=("parallel", "arbitrary"),
            # TODO(synk): derive per generation (v7x: 64 MiB physical VMEM) and
            # single-buffer the weight specs for realistic H.
            vmem_limit_bytes=32 * 1024 * 1024,
        ),
    )(x, wih, whh, b)


# ----------------------------------------------------------------------------
# Parameter preparation (pad / transpose / stack once, outside the kernels)
# ----------------------------------------------------------------------------
def _pad_gate_cols(w, H, Hp):
    """[R, 4H] -> [R, 4Hp]: gate g's real columns land at g*Hp .. g*Hp+H-1."""
    parts = [jnp.pad(w[:, g * H:(g + 1) * H], ((0, 0), (0, Hp - H)))
             for g in range(4)]
    return jnp.concatenate(parts, axis=1)


def prepare_params(params):
    H = params["d_ctx"]
    Hp = _round_up(H, LANE)
    d_emb = params["d_emb"]
    De_p = _round_up(d_emb, LANE)

    emb = params["embed"]                                            # [V, d_emb]
    emb_p = jnp.pad(emb, ((0, 0), (0, De_p - d_emb)))                # [V, De_p]

    layers = []
    for li, layer in enumerate(params["layers"]):
        wihs, whhs, bs = [], [], []
        for dname in ("fwd", "bwd"):
            w_ih, w_hh, bias = layer[dname]          # [4H, Din], [4H, H], [4H]
            wih_t = w_ih.T                            # [Din, 4H]
            if li == 0:
                wih_rows = jnp.pad(wih_t, ((0, De_p - d_emb), (0, 0)))
            else:
                # layer>=1 input layout is [fwd Hp | bwd Hp]; real lanes are the
                # first H entries of each half.
                fwd_rows = jnp.pad(wih_t[:H], ((0, Hp - H), (0, 0)))
                bwd_rows = jnp.pad(wih_t[H:], ((0, Hp - H), (0, 0)))
                wih_rows = jnp.concatenate([fwd_rows, bwd_rows], axis=0)
            wih_p = _pad_gate_cols(wih_rows, H, Hp)                          # [Dp, 4Hp]
            whh_p = _pad_gate_cols(jnp.pad(w_hh.T, ((0, Hp - H), (0, 0))), H, Hp)
            b_p = _pad_gate_cols(bias[None, :], H, Hp)                       # [1, 4Hp]
            wihs.append(wih_p)
            whhs.append(whh_p)
            bs.append(b_p)
        layers.append({"wih": jnp.stack(wihs, 0),     # [2, Dp, 4Hp]
                       "whh": jnp.stack(whhs, 0),     # [2, Hp, 4Hp]
                       "b": jnp.stack(bs, 0)})        # [2, 1, 4Hp]
    return {"embed": emb_p, "layers": layers,
            "H": H, "Hp": Hp, "d_emb": d_emb, "De_p": De_p}


def lstm_layer_forward(ids, kparams, *, t_chunk=None, unroll=8):
    """Full LstmLayer.forward: embedding + n_layer bidirectional LSTM."""
    B, T = ids.shape
    H, Hp = kparams["H"], kparams["Hp"]
    De_p = kparams["De_p"]
    Bp = _round_up(B, SUBLANE)
    if t_chunk is None:
        t_chunk = _pick_time_chunk(T)
    Tp = _round_up(T, t_chunk)         # time padded to a multiple of the chunk

    # Single transform at entry (tiny int array): batch-first -> time-major,
    # pad batch to the sublane and time to the chunk (padded ids = 0).
    ids_tm = jnp.transpose(ids.astype(jnp.int32), (1, 0))            # [T, B]
    ids_tm = jnp.pad(ids_tm, ((0, Tp - T), (0, Bp - B)))              # [Tp, Bp]
    x = embed_lookup(ids_tm.reshape(-1), kparams["embed"], Tp, Bp, De_p)

    for layer in kparams["layers"]:
        x = lstm_bidir_layer(x, layer["wih"], layer["whh"], layer["b"],
                             t_chunk=t_chunk, t_real=T, unroll=unroll)

    # Single transform at exit: strip padding, back to batch-first.
    fwd = x[:T, :B, 0:H]
    bwd = x[:T, :B, Hp:Hp + H]
    out = jnp.concatenate([fwd, bwd], axis=-1)                        # [T, B, 2H]
    return jnp.transpose(out, (1, 0, 2))                              # [B, T, 2H]


# ----------------------------------------------------------------------------
# Pure-JAX reference (same math, unpadded) for correctness checking
# ----------------------------------------------------------------------------
def ref_lstm_direction(x_tbd, w_ih, w_hh, bias):
    T, B, _ = x_tbd.shape
    H = w_hh.shape[1]
    h = jnp.zeros((B, H), jnp.float32)
    c = jnp.zeros((B, H), jnp.float32)
    outs = []
    for t in range(T):
        gates = x_tbd[t] @ w_ih.T + h @ w_hh.T + bias
        i = jax.nn.sigmoid(gates[:, 0 * H:1 * H])
        f = jax.nn.sigmoid(gates[:, 1 * H:2 * H])
        g = jnp.tanh(gates[:, 2 * H:3 * H])
        o = jax.nn.sigmoid(gates[:, 3 * H:4 * H])
        c = f * c + i * g
        h = o * jnp.tanh(c)
        outs.append(h)
    return jnp.stack(outs, 0)


def ref_forward(ids, params):
    x = params["embed"][ids]
    for layer in params["layers"]:
        x_tm = jnp.transpose(x, (1, 0, 2))
        fwd = ref_lstm_direction(x_tm, *layer["fwd"])
        bwd = ref_lstm_direction(x_tm[::-1], *layer["bwd"])[::-1]
        x = jnp.transpose(jnp.concatenate([fwd, bwd], axis=-1), (1, 0, 2))
    return x


# ----------------------------------------------------------------------------
# Deterministic parameter init (mirrors nn.Embedding / nn.LSTM shapes)
# ----------------------------------------------------------------------------
def init_params(key, n_layer, d_ctx, d_emb, n_vocab):
    keys = iter(jax.random.split(key, 2 + n_layer * 16))
    emb = jax.random.normal(next(keys), (n_vocab, d_emb), jnp.float32)
    emb = emb.at[0].set(0.0)                              # padding_idx=0
    stdv = 1.0 / math.sqrt(d_ctx)

    def uni(k, shape):
        return jax.random.uniform(k, shape, jnp.float32, -stdv, stdv)

    layers = []
    for l in range(n_layer):
        d_in = d_emb if l == 0 else 2 * d_ctx
        layer = {}
        for dname in ("fwd", "bwd"):
            w_ih = uni(next(keys), (4 * d_ctx, d_in))
            w_hh = uni(next(keys), (4 * d_ctx, d_ctx))
            b_ih = uni(next(keys), (4 * d_ctx,))
            b_hh = uni(next(keys), (4 * d_ctx,))
            layer[dname] = (w_ih, w_hh, b_ih + b_hh)      # biases summed once
        layers.append(layer)
    return {"embed": emb, "layers": layers,
            "d_ctx": d_ctx, "d_emb": d_emb, "n_vocab": n_vocab}


# ----------------------------------------------------------------------------
if __name__ == "__main__":
    n_layer, d_ctx, d_emb, n_vocab = 2, 32, 32, 50

    key = jax.random.PRNGKey(0)
    k_par, k_ids, k_ids2 = jax.random.split(key, 3)
    params = init_params(k_par, n_layer, d_ctx, d_emb, n_vocab)
    kparams = prepare_params(params)

    # Check 1: batch=2, seq=8 (single chunk, no time padding).
    ids = jax.random.randint(k_ids, (2, 8), 0, n_vocab, jnp.int32)
    out = jax.block_until_ready(lstm_layer_forward(ids, kparams))
    assert out.shape == (2, 8, 2 * d_ctx), out.shape
    ref = jax.block_until_ready(ref_forward(ids, params))
    np.testing.assert_allclose(np.asarray(out), np.asarray(ref),
                               rtol=1e-4, atol=1e-4)

    # Check 2: batch=3, seq=5 with t_chunk=4 -> exercises batch padding, time
    # padding (masked steps) and the multi-chunk recurrent carry path.
    ids2 = jax.random.randint(k_ids2, (3, 5), 0, n_vocab, jnp.int32)
    out2 = jax.block_until_ready(lstm_layer_forward(ids2, kparams, t_chunk=4))
    assert out2.shape == (3, 5, 2 * d_ctx), out2.shape
    ref2 = jax.block_until_ready(ref_forward(ids2, params))
    np.testing.assert_allclose(np.asarray(out2), np.asarray(ref2),
                               rtol=1e-4, atol=1e-4)

    print("KERNEL_OK")
</pallas_src>

<mosaic_0001>
module attributes {stable_mosaic.version = 11 : i64} {
  func.func @embed_kernel(%arg0: i32, %arg1: memref<64xi32, #tpu.memory_space<smem>>, %arg2: memref<50x128xf32, #tpu.memory_space<vmem>>, %arg3: memref<1x8x128xf32, #tpu.memory_space<vmem>>) attributes {dimension_semantics = [#tpu.dimension_semantics<arbitrary>], iteration_bounds = array<i64: 8>, scalar_prefetch = 0 : i64, scratch_operands = 0 : i64, tpu.core_type = #tpu.core_type<tc>, window_params = [{transform_indices = @transform_0, window_bounds = array<i64: 64>}, {pipeline_mode = #tpu.pipeline_mode<synchronous>, transform_indices = @transform_1, window_bounds = array<i64: 50, 128>}, {transform_indices = @transform_2, window_bounds = array<i64: 1, 8, 128>}]} {
    %c8_i32 = arith.constant 8 : i32
    %0 = arith.muli %arg0, %c8_i32 : i32
    %c0_i32 = arith.constant 0 : i32
    %1 = arith.addi %0, %c0_i32 : i32
    %2 = arith.index_cast %1 : i32 to index
    %3 = memref.load %arg1[%2] : memref<64xi32, #tpu.memory_space<smem>>
    %4 = arith.index_cast %3 : i32 to index
    %c0 = arith.constant 0 : index
    %5 = vector.load %arg2[%4, %c0] : memref<50x128xf32, #tpu.memory_space<vmem>>, vector<1x128xf32>
    %c0_0 = arith.constant 0 : index
    %c0_1 = arith.constant 0 : index
    %c0_2 = arith.constant 0 : index
    %6 = vector.load %arg3[%c0_0, %c0_1, %c0_2] : memref<1x8x128xf32, #tpu.memory_space<vmem>>, vector<1x1x128xf32>
    %7 = vector.shape_cast %6 : vector<1x1x128xf32> to vector<1x128xf32>
    %8 = vector.shape_cast %5 : vector<1x128xf32> to vector<1x1x128xf32>
    tpu.vector_store %arg3[%c0_0, %c0_1, %c0_2], %8 {strides = array<i32>} : memref<1x8x128xf32, #tpu.memory_space<vmem>>, vector<1x1x128xf32>,
    %c8_i32_3 = arith.constant 8 : i32
    %9 = arith.muli %arg0, %c8_i32_3 : i32
    %c1_i32 = arith.constant 1 : i32
    %10 = arith.addi %9, %c1_i32 : i32
    %11 = arith.index_cast %10 : i32 to index
    %12 = memref.load %arg1[%11] : memref<64xi32, #tpu.memory_space<smem>>
    %13 = arith.index_cast %12 : i32 to index
    %c0_4 = arith.constant 0 : index
    %14 = vector.load %arg2[%13, %c0_4] : memref<50x128xf32, #tpu.memory_space<vmem>>, vector<1x128xf32>
    %c0_5 = arith.constant 0 : index
    %c1 = arith.constant 1 : index
    %c0_6 = arith.constant 0 : index
    %15 = vector.load %arg3[%c0_5, %c1, %c0_6] : memref<1x8x128xf32, #tpu.memory_space<vmem>>, vector<1x1x128xf32>
    %16 = vector.shape_cast %15 : vector<1x1x128xf32> to vector<1x128xf32>
    %17 = vector.shape_cast %14 : vector<1x128xf32> to vector<1x1x128xf32>
    tpu.vector_store %arg3[%c0_5, %c1, %c0_6], %17 {strides = array<i32>} : memref<1x8x128xf32, #tpu.memory_space<vmem>>, vector<1x1x128xf32>,
    %c8_i32_7 = arith.constant 8 : i32
    %18 = arith.muli %arg0, %c8_i32_7 : i32
    %c2_i32 = arith.constant 2 : i32
    %19 = arith.addi %18, %c2_i32 : i32
    %20 = arith.index_cast %19 : i32 to index
    %21 = memref.load %arg1[%20] : memref<64xi32, #tpu.memory_space<smem>>
    %22 = arith.index_cast %21 : i32 to index
    %c0_8 = arith.constant 0 : index
    %23 = vector.load %arg2[%22, %c0_8] : memref<50x128xf32, #tpu.memory_space<vmem>>, vector<1x128xf32>
    %c0_9 = arith.constant 0 : index
    %c2 = arith.constant 2 : index
    %c0_10 = arith.constant 0 : index
    %24 = vector.load %arg3[%c0_9, %c2, %c0_10] : memref<1x8x128xf32, #tpu.memory_space<vmem>>, vector<1x1x128xf32>
    %25 = vector.shape_cast %24 : vector<1x1x128xf32> to vector<1x128xf32>
    %26 = vector.shape_cast %23 : vector<1x128xf32> to vector<1x1x128xf32>
    tpu.vector_store %arg3[%c0_9, %c2, %c0_10], %26 {strides = array<i32>} : memref<1x8x128xf32, #tpu.memory_space<vmem>>, vector<1x1x128xf32>,
    %c8_i32_11 = arith.constant 8 : i32
    %27 = arith.muli %arg0, %c8_i32_11 : i32
    %c3_i32 = arith.constant 3 : i32
    %28 = arith.addi %27, %c3_i32 : i32
    %29 = arith.index_cast %28 : i32 to index
    %30 = memref.load %arg1[%29] : memref<64xi32, #tpu.memory_space<smem>>
    %31 = arith.index_cast %30 : i32 to index
    %c0_12 = arith.constant 0 : index
    %32 = vector.load %arg2[%31, %c0_12] : memref<50x128xf32, #tpu.memory_space<vmem>>, vector<1x128xf32>
    %c0_13 = arith.constant 0 : index
    %c3 = arith.constant 3 : index
    %c0_14 = arith.constant 0 : index
    %33 = vector.load %arg3[%c0_13, %c3, %c0_14] : memref<1x8x128xf32, #tpu.memory_space<vmem>>, vector<1x1x128xf32>
    %34 = vector.shape_cast %33 : vector<1x1x128xf32> to vector<1x128xf32>
    %35 = vector.shape_cast %32 : vector<1x128xf32> to vector<1x1x128xf32>
    tpu.vector_store %arg3[%c0_13, %c3, %c0_14], %35 {strides = array<i32>} : memref<1x8x128xf32, #tpu.memory_space<vmem>>, vector<1x1x128xf32>,
    %c8_i32_15 = arith.constant 8 : i32
    %36 = arith.muli %arg0, %c8_i32_15 : i32
    %c4_i32 = arith.constant 4 : i32
    %37 = arith.addi %36, %c4_i32 : i32
    %38 = arith.index_cast %37 : i32 to index
    %39 = memref.load %arg1[%38] : memref<64xi32, #tpu.memory_space<smem>>
    %40 = arith.index_cast %39 : i32 to index
    %c0_16 = arith.constant 0 : index
    %41 = vector.load %arg2[%40, %c0_16] : memref<50x128xf32, #tpu.memory_space<vmem>>, vector<1x128xf32>
    %c0_17 = arith.constant 0 : index
    %c4 = arith.constant 4 : index
    %c0_18 = arith.constant 0 : index
    %42 = vector.load %arg3[%c0_17, %c4, %c0_18] : memref<1x8x128xf32, #tpu.memory_space<vmem>>, vector<1x1x128xf32>
    %43 = vector.shape_cast %42 : vector<1x1x128xf32> to vector<1x128xf32>
    %44 = vector.shape_cast %41 : vector<1x128xf32> to vector<1x1x128xf32>
    tpu.vector_store %arg3[%c0_17, %c4, %c0_18], %44 {strides = array<i32>} : memref<1x8x128xf32, #tpu.memory_space<vmem>>, vector<1x1x128xf32>,
    %c8_i32_19 = arith.constant 8 : i32
    %45 = arith.muli %arg0, %c8_i32_19 : i32
    %c5_i32 = arith.constant 5 : i32
    %46 = arith.addi %45, %c5_i32 : i32
    %47 = arith.index_cast %46 : i32 to index
    %48 = memref.load %arg1[%47] : memref<64xi32, #tpu.memory_space<smem>>
    %49 = arith.index_cast %48 : i32 to index
    %c0_20 = arith.constant 0 : index
    %50 = vector.load %arg2[%49, %c0_20] : memref<50x128xf32, #tpu.memory_space<vmem>>, vector<1x128xf32>
    %c0_21 = arith.constant 0 : index
    %c5 = arith.constant 5 : index
    %c0_22 = arith.constant 0 : index
    %51 = vector.load %arg3[%c0_21, %c5, %c0_22] : memref<1x8x128xf32, #tpu.memory_space<vmem>>, vector<1x1x128xf32>
    %52 = vector.shape_cast %51 : vector<1x1x128xf32> to vector<1x128xf32>
    %53 = vector.shape_cast %50 : vector<1x128xf32> to vector<1x1x128xf32>
    tpu.vector_store %arg3[%c0_21, %c5, %c0_22], %53 {strides = array<i32>} : memref<1x8x128xf32, #tpu.memory_space<vmem>>, vector<1x1x128xf32>,
    %c8_i32_23 = arith.constant 8 : i32
    %54 = arith.muli %arg0, %c8_i32_23 : i32
    %c6_i32 = arith.constant 6 : i32
    %55 = arith.addi %54, %c6_i32 : i32
    %56 = arith.index_cast %55 : i32 to index
    %57 = memref.load %arg1[%56] : memref<64xi32, #tpu.memory_space<smem>>
    %58 = arith.index_cast %57 : i32 to index
    %c0_24 = arith.constant 0 : index
    %59 = vector.load %arg2[%58, %c0_24] : memref<50x128xf32, #tpu.memory_space<vmem>>, vector<1x128xf32>
    %c0_25 = arith.constant 0 : index
    %c6 = arith.constant 6 : index
    %c0_26 = arith.constant 0 : index
    %60 = vector.load %arg3[%c0_25, %c6, %c0_26] : memref<1x8x128xf32, #tpu.memory_space<vmem>>, vector<1x1x128xf32>
    %61 = vector.shape_cast %60 : vector<1x1x128xf32> to vector<1x128xf32>
    %62 = vector.shape_cast %59 : vector<1x128xf32> to vector<1x1x128xf32>
    tpu.vector_store %arg3[%c0_25, %c6, %c0_26], %62 {strides = array<i32>} : memref<1x8x128xf32, #tpu.memory_space<vmem>>, vector<1x1x128xf32>,
    %c8_i32_27 = arith.constant 8 : i32
    %63 = arith.muli %arg0, %c8_i32_27 : i32
    %c7_i32 = arith.constant 7 : i32
    %64 = arith.addi %63, %c7_i32 : i32
    %65 = arith.index_cast %64 : i32 to index
    %66 = memref.load %arg1[%65] : memref<64xi32, #tpu.memory_space<smem>>
    %67 = arith.index_cast %66 : i32 to index
    %c0_28 = arith.constant 0 : index
    %68 = vector.load %arg2[%67, %c0_28] : memref<50x128xf32, #tpu.memory_space<vmem>>, vector<1x128xf32>
    %c0_29 = arith.constant 0 : index
    %c7 = arith.constant 7 : index
    %c0_30 = arith.constant 0 : index
    %69 = vector.load %arg3[%c0_29, %c7, %c0_30] : memref<1x8x128xf32, #tpu.memory_space<vmem>>, vector<1x1x128xf32>
    %70 = vector.shape_cast %69 : vector<1x1x128xf32> to vector<1x128xf32>
    %71 = vector.shape_cast %68 : vector<1x128xf32> to vector<1x1x128xf32>
    tpu.vector_store %arg3[%c0_29, %c7, %c0_30], %71 {strides = array<i32>} : memref<1x8x128xf32, #tpu.memory_space<vmem>>, vector<1x1x128xf32>,
    return
  }
  func.func @transform_0(%arg0: i32) -> i32 {
    %c0_i32 = arith.constant 0 : i32
    %c0_i32_0 = arith.constant 0 : i32
    return %c0_i32 : i32
  }
  func.func @transform_1(%arg0: i32) -> (i32, i32) {
    %c0_i32 = arith.constant 0 : i32
    %c0_i32_0 = arith.constant 0 : i32
    %c0_i32_1 = arith.constant 0 : i32
    return %c0_i32, %c0_i32_0 : i32, i32
  }
  func.func @transform_2(%arg0: i32) -> (i32, i32, i32) {
    %c0_i32 = arith.constant 0 : i32
    %c0_i32_0 = arith.constant 0 : i32
    %c0_i32_1 = arith.constant 0 : i32
    return %arg0, %c0_i32, %c0_i32_0 : i32, i32, i32
  }
}

</mosaic_0001>

<bundles_post_ra>
// kernel: tpu_custom_call.1
= control target key start
LH: loop header
LB: loop body
LE: loop exit
PB: predicated region body
PF: predicated region fallthrough
CT: control target
= control target key end

     0   :  { %s659_s0 = inlined_call_operand.hbm [shape: s32[64], index: 0, kind: input, shape index: {}]   ;;  %s660_s1 = inlined_call_operand.hbm [shape: f32[50,128], index: 1, kind: input, shape index: {}]   ;;  %s661_s2 = inlined_call_operand.hbm [shape: f32[8,8,128], index: 2, kind: output, shape index: {}]  }
   0x1   :  { %664 = sst [smem:[#allocation11_spill]] %s659_s0 }
   0x2   :  { %7 = vsyncpa [#allocation5], 0 }
   0x3   :  { %8 = vsyncpa [#allocation3], 0 }
   0x4   :  { %9 = vsyncpa [#allocation4], 0 }
   0x5   :  { %11 = vsyncpa [#allocation4 + $0x1], 0  ;;  %s490_s9 = smov 0   ;;  %s492_s10 = smov 0  }
   0x6   :  { %s494_s11 = smov 0   ;;  %s496_s12 = smov 0  }
   0x7 LB: > { %s511_s13 = sadd.s32 4294967295, %s468_s12   ;;  %s282_s14 = sadd.s32 4294967294, %s468_s12   ;;  %s468_s12 = sphi %s496_s12, %s679_s12   ;;  %s464_s11 = sphi %s494_s11, %s678_s11   ;;  %s460_s10 = sphi %s492_s10, %s677_s10   ;;  %s456_s9 = sphi %s490_s9, %s676_s9  }
   0x8   : > { %s515_s15 = sadd.s32 1, %s468_s12   ;;  %s66_s16 = sadd.s32 1, %s464_s11 }
   0x9   : > { %s63_s17 = ssub.s32 %s468_s12, %s515_s15  ;;  %p76_p0 = scmp.ne.s32.totalorder %s464_s11, %s460_s10 }
   0xa   : > { %p64_p1 = scmp.eq.s32.totalorder %s63_s17, 0  ;;  %p77_p2 = scmp.eq.s32.totalorder %s511_s13, 7 }
   0xb   : > { %p82_p3 = scmp.ne.s32.totalorder %s460_s10, %s456_s9  ;;  %p83_p4 = scmp.eq.s32.totalorder %s282_s14, 7 }
   0xc   : > { %s526_s18 = scalar_select %p64_p1, %s464_s11, %s66_s16  }
   0xd   : > { %p528_p5 = por %p77_p2, %p76_p0  ;;  %p532_p6 = por %p83_p4, %p82_p3 }
   0xe   : > { %p283_p7 = scmp.ge.s32.totalorder %s468_s12, 1  ;;  %p90_p8 = scmp.lt.s32.totalorder %s468_s12, 9 }
   0xf   : > { %s666_s20 = scalar_select %p532_p6, 1, 0 }
  0x10   : > { %p538_p9 = pnand %p283_p7, %p90_p8  ;;  %p662_p10 = scmp.eq.s32.totalorder %s511_s13, 0 }
  0x11   : > { %s470_s22 = smov [#allocation6]   ;;  %s669_s0 = sld [smem:[#allocation11_spill]] }
  0x12   : > { %p305_p11 = pneg %p538_p9  ;;  %s111_s23 = sshll.u32 %s470_s22, 4  ;;  %s551_s23 = int_to_ptr.vmem [resolvable:$true] %s111_s23 }
  0x14   : > { %p547_p12 = pnand %p662_p10, %p305_p11 }
  0x16   : > { %p359_p0 = pneg %p547_p12 }
  0x17   : > { %s357_s27 = scalar_lea.hbm %s669_s0, 16 }
  0x18   : > { %p358_p13 = scmp.ne.s32.totalorder %s669_s0, %s357_s27  ;;  %p364_p3 = scmp.lt.u32.totalorder %s357_s27, %s669_s0 }
  0x1a   : > { %p360_p1 = pnand %p359_p0, %p358_p13 }
  0x1c   : > { %p361_p2 = pneg %p360_p1 }
  0x1e   : > { %p366_p4 = pnand %p364_p3, %p361_p2 }
  0x20   : > { %369 = shalt.err (!%p366_p4)
}
  0x21   : > { %s471_s4 = smov [#allocation2]   ;;  %s370_s14 = scalar_lea.hbm %s660_s1, 896 }
  0x22   : > { %308 = dma.hbm_to_smem (!%p547_p12), %s669_s0, 16, %s471_s4, [#allocation5]  }
  0x23   : > { %p371_p7 = scmp.ne.s32.totalorder %s660_s1, %s370_s14  ;;  %p377_p13 = scmp.lt.u32.totalorder %s370_s14, %s660_s1 }
  0x25   : > { %p373_p8 = pnand %p371_p7, %p359_p0 }
  0x27   : > { %p374_p11 = pneg %p373_p8 }
  0x29   : > { %p379_p1 = pnand %p377_p13, %p374_p11 }
  0x2b   : > { %382 = shalt.err (!%p379_p1)
}
  0x2c   : > { %s383_s26 = scalar_lea.vmem %s551_s23, 896  ;;  %p391_p10 = scmp.lt.s32.totalorder %s551_s23, %s551_s23 }
  0x2d   : > { %p384_p2 = scmp.ne.s32.totalorder %s551_s23, %s383_s26  ;;  %p392_p7 = scmp.lt.s32.totalorder %s383_s26, %s383_s26 }
  0x2f   : > { %p386_p3 = pnand %p384_p2, %p359_p0  ;;  %p393_p8 = por %p392_p7, %p391_p10 }
  0x31   : > { %p387_p4 = pneg %p386_p3 }
  0x33   : > { %p394_p6 = pnand %p393_p8, %p387_p4 }
  0x35   : > { %397 = shalt.err (!%p394_p6)
}
  0x36   : > { %s472_s27 = smov 128   ;;  %s473_s28 = smov 8  }
  0x37   : > { %311 = dma.hbm_to_vmem [thread:$0]  (!%p547_p12), %s660_s1, 896, %s551_s23, [#allocation3], %s472_s27, %s472_s27, %s473_s28  }
  0x38   : > { %127 = sbr.rel (%p538_p9) target bundleno = 109 (0x6d), region = 28  ;;  %p670_p0 = scmp.eq.s32.totalorder (!%p538_p9), %s511_s13, 0 }
  0x3f   : > { %443 = dma.done.wait (%p670_p0), [#allocation5], 16   ;;  %p671_p11 = pmov %p670_p0 }
  0x40   : > { %p672_p6 = pmov %p670_p0 }
  0x41   : > { %445 = vsyncadd (%p671_p11), [#allocation5], 4294967280 }
  0x42   : > { %447 = dma.done.wait (%p672_p6), [#allocation3], 896   ;;  %p673_p10 = pmov %p670_p0 }
  0x44   : > { %449 = vsyncadd (%p673_p10), [#allocation3], 4294966400 }
  0x45   : > { %137 = sfence }
  0x46   : > { %s663_s23 = sand.u32 1, %s460_s10   ;;  %s290_s24 = sshll.u32 %s511_s13, 3 }
  0x47   : > { %s289_s21 = sshll.u32 %s663_s23, 3  ;;  %s150_s3 = sld [smem:[#allocation2 + %s290_s24]] }
  0x48   : > { %s154_s4 = sadd.s32 1, %s290_s24  ;;  %s159_s5 = sadd.s32 2, %s290_s24 }
  0x49   : > { %s155_s6 = sld [smem:[#allocation2 + %s154_s4]]  ;;  %s164_s8 = sadd.s32 3, %s290_s24 }
  0x4a   : > { %s160_s7 = sld [smem:[#allocation2 + %s159_s5]]  ;;  %s169_s14 = sadd.s32 4, %s290_s24 }
  0x4b   : > { %s165_s16 = sld [smem:[#allocation2 + %s164_s8]]  ;;  %s174_s22 = sadd.s32 5, %s290_s24 }
  0x4c   : > { %s170_s17 = sld [smem:[#allocation2 + %s169_s14]]  ;;  %s179_s27 = sadd.s32 6, %s290_s24 }
  0x4d   : > { %s151_s25 = scalar_lea.vmem [#allocation6], %s150_s3  ;;  %s175_s26 = sld [smem:[#allocation2 + %s174_s22]] }
  0x4e   : > { %v152_v0 = vld [vmem:[%s151_s25] sm:$0x1]  ;;  %s148_s28 = scalar_lea.vmem [#allocation7], %s289_s21  ;;  %s180_s29 = sld [smem:[#allocation2 + %s179_s27]] }
  0x4f   : > { %153 = vst [vmem:[%s148_s28] sm:$0x1] %v152_v0  ;;  %s184_s30 = sadd.s32 7, %s290_s24  ;;  %s156_s23 = scalar_lea.vmem [#allocation6], %s155_s6 }
  0x50   : > { %v157_v1 = vld [vmem:[%s156_s23] sm:$0x1]  ;;  %s161_s0 = scalar_lea.vmem [#allocation6], %s160_s7  ;;  %s185_s4 = sld [smem:[#allocation2 + %s184_s30]] }
  0x51   : > { %v162_v2 = vld [vmem:[%s161_s0] sm:$0x1]  ;;  %158 = vst [vmem:[%s148_s28 + $0x1] sm:$0x1] %v157_v1  ;;  %s166_s5 = scalar_lea.vmem [#allocation6], %s165_s16  ;;  %s292_s3 = sshll.u32 %s511_s13, 7 }
  0x52   : > { %163 = vst [vmem:[%s148_s28 + $0x2] sm:$0x1] %v162_v2  ;;  %v167_v3 = vld [vmem:[%s166_s5] sm:$0x1]  ;;  %s171_s8 = scalar_lea.vmem [#allocation6], %s170_s17  ;;  %s203_s21 = sshll.u32 %s148_s28, 4  ;;  %s617_s21 = int_to_ptr.vmem [resolvable:$true] %s203_s21 }
  0x53   : > { %v172_v4 = vld [vmem:[%s171_s8] sm:$0x1]  ;;  %168 = vst [vmem:[%s148_s28 + $0x3] sm:$0x1] %v167_v3  ;;  %s176_s14 = scalar_lea.vmem [#allocation6], %s175_s26  ;;  %s615_s6 = scalar_lea.hbm %s661_s2, %s292_s3 }
  0x54   : > { %173 = vst [vmem:[%s148_s28 + $0x4] sm:$0x1] %v172_v4  ;;  %v177_v5 = vld [vmem:[%s176_s14] sm:$0x1]  ;;  %s181_s24 = scalar_lea.vmem [#allocation6], %s180_s29  ;;  %s674_s7 = sand.u32 1, %s460_s10  }
  0x55   : > { %178 = vst [vmem:[%s148_s28 + $0x5] sm:$0x1] %v177_v5  ;;  %v182_v6 = vld [vmem:[%s181_s24] sm:$0x1]  ;;  %s190_s16 = scalar_lea.sflag [#allocation4], %s674_s7  ;;  %s398_s17 = scalar_lea.vmem %s617_s21, 128 }
  0x56   : > { %183 = vst [vmem:[%s148_s28 + $0x6] sm:$0x1] %v182_v6  ;;  %s186_s13 = scalar_lea.vmem [#allocation6], %s185_s4  ;;  %p399_p9 = scmp.ne.s32.totalorder %s617_s21, %s398_s17 }
  0x57   : > { %v187_v7 = vld [vmem:[%s186_s13] sm:$0x1]  ;;  %s474_s22 = smov [#allocation7]  }
  0x58   : > { %188 = vst [vmem:[%s148_s28 + $0x7] sm:$0x1] %v187_v7  ;;  %p400_p12 = pnand %p399_p9, %p528_p5  ;;  %s402_s25 = sshll.u32 %s474_s22, 4  ;;  %s403_s25 = int_to_ptr.vmem [resolvable:$false] %s402_s25 }
  0x59   : > { %s404_s26 = scalar_lea.vmem %s403_s25, 256  ;;  %p405_p1 = scmp.lt.s32.totalorder %s617_s21, %s403_s25 }
  0x5a   : > { %p401_p13 = pneg %p400_p12  ;;  %p406_p2 = scmp.lt.s32.totalorder %s404_s26, %s398_s17 }
  0x5c   : > { %p407_p3 = por %p406_p2, %p405_p1 }
  0x5e   : > { %p408_p4 = pnand %p407_p3, %p401_p13 }
  0x60   : > { %411 = shalt.err (!%p408_p4)
}
  0x61   : > { %s412_s27 = scalar_lea.hbm %s615_s6, 128  ;;  %s416_s30 = scalar_lea.hbm %s661_s2, 1024 }
  0x62   : > { %p413_p7 = scmp.ne.s32.totalorder %s615_s6, %s412_s27  ;;  %p417_p11 = scmp.lt.u32.totalorder %s615_s6, %s661_s2 }
  0x63   : > { %p418_p6 = scmp.lt.u32.totalorder %s416_s30, %s412_s27  ;;  %p420_p9 = scmp.lt.u32.totalorder %s412_s27, %s615_s6 }
  0x64   : > { %p414_p8 = pnand %p413_p7, %p528_p5 }
  0x65   : > { %p419_p10 = por %p418_p6, %p417_p11 }
  0x66   : > { %p415_p0 = pneg %p414_p8 }
  0x67   : > { %p421_p12 = por %p420_p9, %p419_p10 }
  0x69   : > { %p422_p13 = pnand %p421_p12, %p415_p0 }
  0x6b   : > { %425 = shalt.err (!%p422_p13)
}
  0x6c   : > { %303 = dma.vmem_to_hbm [thread:$0]  (%p528_p5), %s617_s21, 128, %s615_s6, %s190_s16  }
  0x6d PF: > { %p320_p1 = scmp.ge.s32.totalorder %s468_s12, 2  ;;  %s215_s8 = sand.u32 1, %s456_s9  }
  0x6e   : > { %p675_p2 = scmp.ne.s32.totalorder %s666_s20, 0  ;;  %s216_s3 = scalar_lea.sflag [#allocation4], %s215_s8 }
  0x70   : > { %p313_p3 = pnand %p320_p1, %p675_p2 }
  0x72   : > { %451 = dma.done.wait (!%p313_p3), %s216_s3, 128  }
  0x73   : > { %453 = vsyncadd (!%p313_p3), %s216_s3, 4294967168  ;;  %p14_p4 = scmp.ge.s32.totalorder %s515_s15, 10   ;;  %s676_s9 = smov %s460_s10 }
  0x74   : > { %s677_s10 = smov %s464_s11  ;;  %s678_s11 = smov %s526_s18 }
  0x75   : > { %s679_s12 = smov %s515_s15  ;;  %16 = sbr.rel (!%p14_p4) target bundleno = 7 (0x7), region = 78 }
  0x7c   :  { %221 = vsyncpa [#allocation3], 1 }
  0x7d   :  { %223 = vsyncpa [#allocation3 + $0x1], 1 }
  0x7e   :  { %224 = vsyncpa [#allocation4], 1 }
  0x7f   :  { %226 = vsyncpa [#allocation4 + $0x1], 1 }
  0x80   :  { %227 = vsyncpa [#allocation5], 1 }
  0x81   :  { %229 = vsyncpa [#allocation5 + $0x1], 1 }

</bundles_post_ra>
